<compile_context>
chip_gen: v5e
topology: v5e:2x2
jax: 0.10.0
libtpu: 0.0.40
codegen_flags: <defaults>
</compile_context>

<pallas_src>
import math

import jax
import jax.numpy as jnp
from jax.experimental import pallas as pl
from jax.experimental.pallas import tpu as pltpu

D_MODEL = 512          # matches the reference script
MAX_LEN = 60           # matches the reference script
DROPOUT_P = 0.1

# drop iff uniform_bits < p * 2^32   <=>   keep iff bits >= threshold
_KEEP_THRESHOLD = int(round(DROPOUT_P * (2 ** 32)))
_KEEP_SCALE = 1.0 / (1.0 - DROPOUT_P)


def make_pe(max_len: int, d_model: int, dtype=jnp.float32):
    """Sinusoidal positional-encoding buffer, exactly as the torch __init__."""
    position = jnp.arange(max_len, dtype=jnp.float32)[:, None]                 # (L, 1)
    div_term = jnp.exp(jnp.arange(0, d_model, 2, dtype=jnp.float32)
                       * (-(math.log(10000.0) / d_model)))                     # (D/2,)
    ang = position * div_term                                                  # (L, D/2)
    pe = jnp.zeros((max_len, d_model), dtype=jnp.float32)
    pe = pe.at[:, 0::2].set(jnp.sin(ang))
    pe = pe.at[:, 1::2].set(jnp.cos(ang))
    return pe.astype(dtype)


# ----------------------------------------------------------------------------- kernels

def _pe_dropout_prng_kernel(seed_ref, x_ref, pe_ref, o_ref):
    # seed_ref: (1,) int32 in SMEM (scalar prefetch)
    # x_ref:    (B_blk, S_blk, D) VMEM
    # pe_ref:   (S_blk, D)        VMEM (broadcast over the batch block)
    # o_ref:    (B_blk, S_blk, D) VMEM
    tile_id = pl.program_id(0) * pl.num_programs(1) + pl.program_id(1)
    pltpu.prng_seed(seed_ref[0] + tile_id)                 # distinct stream per tile
    raw = pltpu.prng_random_bits(x_ref.shape)
    bits = raw if raw.dtype == jnp.uint32 else pltpu.bitcast(raw, jnp.uint32)

    scale = jnp.asarray(_KEEP_SCALE, dtype=x_ref.dtype)
    y = (x_ref[...] + pe_ref[...]) * scale                  # fold 1/(1-p) into the add path
    keep = bits >= jnp.uint32(_KEEP_THRESHOLD)
    o_ref[...] = jnp.where(keep, y, jnp.zeros_like(y))


def _pe_dropout_bits_kernel(x_ref, pe_ref, bits_ref, o_ref):
    # Fallback path: host-generated uint32 bits (extra 4 B/elem of HBM traffic).
    scale = jnp.asarray(_KEEP_SCALE, dtype=x_ref.dtype)
    y = (x_ref[...] + pe_ref[...]) * scale
    keep = bits_ref[...] >= jnp.uint32(_KEEP_THRESHOLD)
    o_ref[...] = jnp.where(keep, y, jnp.zeros_like(y))


def _pe_eval_kernel(x_ref, pe_ref, o_ref):
    # Eval mode: dropout is identity.
    o_ref[...] = x_ref[...] + pe_ref[...]


# ------------------------------------------------------------------------ tiling helpers

def _vmem_capacity_bytes() -> int:
    try:
        return int(pltpu.get_tpu_info().vmem_capacity_bytes)
    except Exception:
        return 64 << 20            # assume the most constrained generation (v7x)


def _choose_tiles(B: int, S: int, D: int, itemsize: int):
    """Pick (b_blk, s_blk) so tiles are large but fit every generation's VMEM."""
    cap = _vmem_capacity_bytes()
    # x + out double-buffered (4 tiles) + pe (2 small tiles) must fit with headroom.
    per_array_cap = max(min(cap // 12, 6 << 20), 8 * D * itemsize)

    row_bytes = D * itemsize
    if S * row_bytes <= per_array_cap or S % 8 != 0:
        s_blk = S                                   # full seq (also covers S not /8)
    else:
        s_blk = 8
        for cand in range(S, 7, -8):                # largest multiple-of-8 divisor that fits
            if S % cand == 0 and cand * row_bytes <= per_array_cap:
                s_blk = cand
                break

    b_blk = max(1, per_array_cap // max(s_blk * row_bytes, 1))
    b_blk = min(B, b_blk)
    while B % b_blk != 0:
        b_blk -= 1

    # Guarantee >= 2 grid steps so v7x can shard across both TensorCores and the
    # software pipeline actually overlaps DMA with compute.
    if (B // b_blk) * (S // s_blk) < 2 and B > 1:
        b_blk = B // 2
        while B % b_blk != 0:
            b_blk -= 1
    return b_blk, s_blk


def _compiler_params(b_blk, s_blk, D, itemsize, tiles_per_step):
    tile = b_blk * s_blk * D * itemsize
    pe_tile = s_blk * D * itemsize
    resident = 2 * (tiles_per_step * tile + pe_tile) + (2 << 20)   # double-buffered + margin
    limit = int(min(max(resident, 32 << 20), 48 << 20))            # headroom under v7x 64 MiB
    return pltpu.CompilerParams(
        dimension_semantics=("parallel", "parallel"),
        vmem_limit_bytes=limit,
    )


# ----------------------------------------------------------------------------- wrappers

def _pe_dropout_prng(x, pe_slice, seed: int):
    B, S, D = x.shape
    itemsize = x.dtype.itemsize
    b_blk, s_blk = _choose_tiles(B, S, D, itemsize)
    grid = (B // b_blk, S // s_blk)
    seed_arr = jnp.asarray([seed], dtype=jnp.int32)
    return pl.pallas_call(
        _pe_dropout_prng_kernel,
        out_shape=jax.ShapeDtypeStruct((B, S, D), x.dtype),
        grid_spec=pltpu.PrefetchScalarGridSpec(
            num_scalar_prefetch=1,
            grid=grid,
            in_specs=[
                pl.BlockSpec((b_blk, s_blk, D), lambda i, j, seed_ref: (i, j, 0)),  # x
                pl.BlockSpec((s_blk, D), lambda i, j, seed_ref: (j, 0)),            # pe
            ],
            out_specs=pl.BlockSpec((b_blk, s_blk, D), lambda i, j, seed_ref: (i, j, 0)),
        ),
        compiler_params=_compiler_params(b_blk, s_blk, D, itemsize, tiles_per_step=2),
    )(seed_arr, x, pe_slice)


def _pe_dropout_hostbits(x, pe_slice, seed: int):
    B, S, D = x.shape
    itemsize = x.dtype.itemsize
    b_blk, s_blk = _choose_tiles(B, S, D, itemsize)
    grid = (B // b_blk, S // s_blk)
    bits = jax.random.bits(jax.random.PRNGKey(seed), (B, S, D), dtype=jnp.uint32)
    return pl.pallas_call(
        _pe_dropout_bits_kernel,
        out_shape=jax.ShapeDtypeStruct((B, S, D), x.dtype),
        grid=grid,
        in_specs=[
            pl.BlockSpec((b_blk, s_blk, D), lambda i, j: (i, j, 0)),   # x
            pl.BlockSpec((s_blk, D), lambda i, j: (j, 0)),             # pe
            pl.BlockSpec((b_blk, s_blk, D), lambda i, j: (i, j, 0)),   # bits
        ],
        out_specs=pl.BlockSpec((b_blk, s_blk, D), lambda i, j: (i, j, 0)),
        compiler_params=_compiler_params(b_blk, s_blk, D, itemsize, tiles_per_step=3),
    )(x, pe_slice, bits)


def _pe_eval(x, pe_slice):
    B, S, D = x.shape
    itemsize = x.dtype.itemsize
    b_blk, s_blk = _choose_tiles(B, S, D, itemsize)
    grid = (B // b_blk, S // s_blk)
    return pl.pallas_call(
        _pe_eval_kernel,
        out_shape=jax.ShapeDtypeStruct((B, S, D), x.dtype),
        grid=grid,
        in_specs=[
            pl.BlockSpec((b_blk, s_blk, D), lambda i, j: (i, j, 0)),
            pl.BlockSpec((s_blk, D), lambda i, j: (j, 0)),
        ],
        out_specs=pl.BlockSpec((b_blk, s_blk, D), lambda i, j: (i, j, 0)),
        compiler_params=_compiler_params(b_blk, s_blk, D, itemsize, tiles_per_step=2),
    )(x, pe_slice)


def positional_encoding(x, pe, *, seed: int = 0, training: bool = True):
    """x: (B, S, D) float, pe: (max_len, D) float.  Returns dropout(x + pe[:S])."""
    B, S, D = x.shape
    pe_slice = pe[:S]                       # == self.pe[:, :x.size(1)]

    if not training:
        return _pe_eval(x, pe_slice)

    try:
        out = _pe_dropout_prng(x, pe_slice, seed)
        return jax.block_until_ready(out)
    except Exception:
        # TODO(synk): fallback only for backends without the on-chip PRNG lowering
        # (e.g. interpret mode); it re-adds 4 B/elem of HBM traffic.
        return _pe_dropout_hostbits(x, pe_slice, seed)


# -------------------------------------------------------------------------------- main

if __name__ == "__main__":
    key = jax.random.PRNGKey(0)
    B, S = 2, 8   # batch=2 as in the torch snippet; small seq, d_model=512

    # x stands in for the word-embedding output fed to PositionalEncoding.forward
    x = jax.random.normal(key, (B, S, D_MODEL), dtype=jnp.float32)
    pe = make_pe(MAX_LEN, D_MODEL)

    out = positional_encoding(x, pe, seed=0, training=True)
    out = jax.block_until_ready(out)
    assert out.shape == (B, S, D_MODEL)
    assert out.dtype == x.dtype

    # The PyTorch dropout RNG stream cannot be bit-matched; verify structure instead:
    # every element is either exactly 0 (dropped) or equals (x + pe) / (1 - p) (kept),
    # and roughly p of the elements are dropped.
    y_ref = (x + pe[:S][None]) * _KEEP_SCALE
    dropped = (out == 0.0)
    kept_match = jnp.isclose(out, y_ref, atol=1e-5, rtol=1e-5)
    assert bool(jnp.all(dropped | kept_match))
    drop_frac = float(jnp.mean(dropped.astype(jnp.float32)))
    assert 0.02 <= drop_frac <= 0.25, drop_frac

    # Eval mode: identity dropout, exact match to x + pe.
    out_eval = jax.block_until_ready(positional_encoding(x, pe, training=False))
    assert jnp.allclose(out_eval, x + pe[:S][None], atol=1e-6, rtol=1e-6)

    print("KERNEL_OK")
</pallas_src>

<mosaic_0001>
module attributes {stable_mosaic.version = 11 : i64} {
  func.func @_pe_dropout_prng_kernel(%arg0: i32, %arg1: i32, %arg2: memref<1xi32, #tpu.memory_space<smem>>, %arg3: memref<1x8x512xf32, #tpu.memory_space<vmem>>, %arg4: memref<8x512xf32, #tpu.memory_space<vmem>>, %arg5: memref<1x8x512xf32, #tpu.memory_space<vmem>>) attributes {dimension_semantics = [#tpu.dimension_semantics<parallel>, #tpu.dimension_semantics<parallel>], iteration_bounds = array<i64: 2, 1>, scalar_prefetch = 1 : i64, scratch_operands = 0 : i64, tpu.core_type = #tpu.core_type<tc>, window_params = [{transform_indices = @transform_0, window_bounds = array<i64: 1, 8, 512>}, {transform_indices = @transform_1, window_bounds = array<i64: 8, 512>}, {transform_indices = @transform_2, window_bounds = array<i64: 1, 8, 512>}]} {
    %c1_i32 = arith.constant 1 : i32
    %0 = arith.muli %arg0, %c1_i32 : i32
    %1 = arith.addi %0, %arg1 : i32
    %c0 = arith.constant 0 : index
    %2 = memref.load %arg2[%c0] : memref<1xi32, #tpu.memory_space<smem>>
    %3 = arith.addi %2, %1 : i32
    "tpu.prng_set_seed_32"(%3) : (i32) -> ()
    %4 = "tpu.prng_random_bits"() : () -> vector<1x8x512xi32>
    %5 = tpu.bitcast %4 : vector<1x8x512xi32> -> vector<1x8x512xi32>
    %c0_0 = arith.constant 0 : index
    %c0_1 = arith.constant 0 : index
    %c0_2 = arith.constant 0 : index
    %6 = vector.load %arg3[%c0_0, %c0_1, %c0_2] : memref<1x8x512xf32, #tpu.memory_space<vmem>>, vector<1x8x512xf32>
    %c0_3 = arith.constant 0 : index
    %c0_4 = arith.constant 0 : index
    %7 = vector.load %arg4[%c0_3, %c0_4] : memref<8x512xf32, #tpu.memory_space<vmem>>, vector<8x512xf32>
    %8 = vector.shape_cast %7 : vector<8x512xf32> to vector<1x8x512xf32>
    %9 = arith.addf %6, %8 : vector<1x8x512xf32>
    %cst = arith.constant 1.11111116 : f32
    %10 = vector.broadcast %cst : f32 to vector<1x8x512xf32>
    %11 = arith.mulf %9, %10 : vector<1x8x512xf32>
    %c429496730_i32 = arith.constant 429496730 : i32
    %12 = vector.broadcast %c429496730_i32 : i32 to vector<1x8x512xi32>
    %13 = arith.cmpi uge, %5, %12 : vector<1x8x512xi32>
    %cst_5 = arith.constant 0.000000e+00 : f32
    %14 = vector.broadcast %cst_5 : f32 to vector<1x8x512xf32>
    %15 = arith.select %13, %11, %14 : vector<1x8x512xi1>, vector<1x8x512xf32>
    %c0_6 = arith.constant 0 : index
    %c0_7 = arith.constant 0 : index
    %c0_8 = arith.constant 0 : index
    %16 = vector.load %arg5[%c0_6, %c0_7, %c0_8] : memref<1x8x512xf32, #tpu.memory_space<vmem>>, vector<1x8x512xf32>
    tpu.vector_store %arg5[%c0_6, %c0_7, %c0_8], %15 {strides = array<i32>} : memref<1x8x512xf32, #tpu.memory_space<vmem>>, vector<1x8x512xf32>,
    return
  }
  func.func @transform_0(%arg0: i32, %arg1: i32, %arg2: memref<1xi32, #tpu.memory_space<smem>>) -> (i32, i32, i32) {
    %c0_i32 = arith.constant 0 : i32
    %c0_i32_0 = arith.constant 0 : i32
    return %arg0, %arg1, %c0_i32 : i32, i32, i32
  }
  func.func @transform_1(%arg0: i32, %arg1: i32, %arg2: memref<1xi32, #tpu.memory_space<smem>>) -> (i32, i32) {
    %c0_i32 = arith.constant 0 : i32
    %c0_i32_0 = arith.constant 0 : i32
    return %arg1, %c0_i32 : i32, i32
  }
  func.func @transform_2(%arg0: i32, %arg1: i32, %arg2: memref<1xi32, #tpu.memory_space<smem>>) -> (i32, i32, i32) {
    %c0_i32 = arith.constant 0 : i32
    %c0_i32_0 = arith.constant 0 : i32
    return %arg0, %arg1, %c0_i32 : i32, i32, i32
  }
}

module attributes {stable_mosaic.version = 11 : i64} {
  func.func @_pe_dropout_bits_kernel(%arg0: i32, %arg1: i32, %arg2: memref<1x8x512xf32, #tpu.memory_space<vmem>>, %arg3: memref<8x512xf32, #tpu.memory_space<vmem>>, %arg4: memref<1x8x512xi32, #tpu.memory_space<vmem>>, %arg5: memref<1x8x512xf32, #tpu.memory_space<vmem>>) attributes {dimension_semantics = [#tpu.dimension_semantics<parallel>, #tpu.dimension_semantics<parallel>], iteration_bounds = array<i64: 2, 1>, scalar_prefetch = 0 : i64, scratch_operands = 0 : i64, tpu.core_type = #tpu.core_type<tc>, window_params = [{transform_indices = @transform_0, window_bounds = array<i64: 1, 8, 512>}, {transform_indices = @transform_1, window_bounds = array<i64: 8, 512>}, {transform_indices = @transform_2, window_bounds = array<i64: 1, 8, 512>}, {transform_indices = @transform_3, window_bounds = array<i64: 1, 8, 512>}]} {
    %c0 = arith.constant 0 : index
    %c0_0 = arith.constant 0 : index
    %c0_1 = arith.constant 0 : index
    %0 = vector.load %arg2[%c0, %c0_0, %c0_1] : memref<1x8x512xf32, #tpu.memory_space<vmem>>, vector<1x8x512xf32>
    %c0_2 = arith.constant 0 : index
    %c0_3 = arith.constant 0 : index
    %1 = vector.load %arg3[%c0_2, %c0_3] : memref<8x512xf32, #tpu.memory_space<vmem>>, vector<8x512xf32>
    %2 = vector.shape_cast %1 : vector<8x512xf32> to vector<1x8x512xf32>
    %3 = arith.addf %0, %2 : vector<1x8x512xf32>
    %cst = arith.constant 1.11111116 : f32
    %4 = vector.broadcast %cst : f32 to vector<1x8x512xf32>
    %5 = arith.mulf %3, %4 : vector<1x8x512xf32>
    %c0_4 = arith.constant 0 : index
    %c0_5 = arith.constant 0 : index
    %c0_6 = arith.constant 0 : index
    %6 = vector.load %arg4[%c0_4, %c0_5, %c0_6] : memref<1x8x512xi32, #tpu.memory_space<vmem>>, vector<1x8x512xi32>
    %c429496730_i32 = arith.constant 429496730 : i32
    %7 = vector.broadcast %c429496730_i32 : i32 to vector<1x8x512xi32>
    %8 = arith.cmpi uge, %6, %7 : vector<1x8x512xi32>
    %cst_7 = arith.constant 0.000000e+00 : f32
    %9 = vector.broadcast %cst_7 : f32 to vector<1x8x512xf32>
    %10 = arith.select %8, %5, %9 : vector<1x8x512xi1>, vector<1x8x512xf32>
    %c0_8 = arith.constant 0 : index
    %c0_9 = arith.constant 0 : index
    %c0_10 = arith.constant 0 : index
    %11 = vector.load %arg5[%c0_8, %c0_9, %c0_10] : memref<1x8x512xf32, #tpu.memory_space<vmem>>, vector<1x8x512xf32>
    tpu.vector_store %arg5[%c0_8, %c0_9, %c0_10], %10 {strides = array<i32>} : memref<1x8x512xf32, #tpu.memory_space<vmem>>, vector<1x8x512xf32>,
    return
  }
  func.func @transform_0(%arg0: i32, %arg1: i32) -> (i32, i32, i32) {
    %c0_i32 = arith.constant 0 : i32
    %c0_i32_0 = arith.constant 0 : i32
    return %arg0, %arg1, %c0_i32 : i32, i32, i32
  }
  func.func @transform_1(%arg0: i32, %arg1: i32) -> (i32, i32) {
    %c0_i32 = arith.constant 0 : i32
    %c0_i32_0 = arith.constant 0 : i32
    return %arg1, %c0_i32 : i32, i32
  }
  func.func @transform_2(%arg0: i32, %arg1: i32) -> (i32, i32, i32) {
    %c0_i32 = arith.constant 0 : i32
    %c0_i32_0 = arith.constant 0 : i32
    return %arg0, %arg1, %c0_i32 : i32, i32, i32
  }
  func.func @transform_3(%arg0: i32, %arg1: i32) -> (i32, i32, i32) {
    %c0_i32 = arith.constant 0 : i32
    %c0_i32_0 = arith.constant 0 : i32
    return %arg0, %arg1, %c0_i32 : i32, i32, i32
  }
}

</mosaic_0001>

<bundles_post_ra>
// kernel: tpu_custom_call.1
= control target key start
LH: loop header
LB: loop body
LE: loop exit
PB: predicated region body
PF: predicated region fallthrough
CT: control target
= control target key end

     0   :  { %s930_s0 = inlined_call_operand.<no memory space> [shape: s32[1], index: 0, kind: input, shape index: {}]   ;;  %s931_s1 = inlined_call_operand.hbm [shape: f32[2,8,512], index: 1, kind: input, shape index: {}]   ;;  %s932_s2 = inlined_call_operand.hbm [shape: f32[8,512], index: 2, kind: input, shape index: {}]   ;;  %s933_s3 = inlined_call_operand.hbm [shape: f32[2,8,512], index: 3, kind: output, shape index: {}]  }
   0x1   :  { %8 = sst [smem:[#allocation3]] %s930_s0 }
   0x2   :  { %9 = vsyncpa [#allocation5], 0 }
   0x3   :  { %11 = vsyncpa [#allocation5 + $0x1], 0 }
   0x4   :  { %12 = vsyncpa [#allocation8], 0 }
   0x5   :  { %13 = vsyncpa [#allocation6], 0 }
   0x6   :  { %15 = vsyncpa [#allocation6 + $0x1], 0  ;;  %s753_s14 = smov 0   ;;  %s755_s15 = smov 0  }
   0x7   :  { %s757_s16 = smov 0   ;;  %s759_s17 = smov 0  }
   0x8   :  { %s761_s18 = smov 0   ;;  %s763_s19 = smov 0  }
   0x9 LB: > { %s485_s0 = sadd.s32 4294967295, %s727_s19   ;;  %s486_s20 = sadd.s32 4294967294, %s727_s19   ;;  %s727_s19 = sphi %s763_s19, %s21_s19   ;;  %s723_s18 = sphi %s761_s18, %s945_s18   ;;  %s719_s17 = sphi %s759_s17, %s944_s17   ;;  %s715_s16 = sphi %s757_s16, %s943_s16   ;;  %s711_s15 = sphi %s755_s15, %s942_s15   ;;  %s707_s14 = sphi %s753_s14, %s941_s14  }
   0xa   : > { %p55_p0 = scmp.ne.s32.totalorder %s711_s15, %s707_s14  ;;  %p787_p1 = scmp.eq.s32.totalorder %s485_s0, 0 }
   0xb   : > { %p791_p2 = scmp.eq.s32.totalorder %s485_s0, 1  ;;  %p113_p3 = scmp.eq.s32.totalorder %s486_s20, 1 }
   0xc   : > { %p797_p4 = por %p787_p1, %p55_p0  ;;  %p487_p5 = scmp.ge.s32.totalorder %s727_s19, 1 }
   0xd   : > { %p802_p6 = por %p113_p3, %p55_p0  ;;  %p120_p7 = scmp.lt.s32.totalorder %s727_s19, 3 }
   0xe   : > { %s135_s27 = sshll.u32 %s932_s2, 4  ;;  %p489_p9 = scmp.ge.s32.totalorder %s727_s19, 2  ;;  %s136_s27 = int_to_ptr.hbm [resolvable:$true] %s135_s27 }
   0xf   : > { %p810_p8 = pnand %p487_p5, %p120_p7  ;;  %s729_s29 = smov [#allocation7]  }
  0x10   : > { %s137_s30 = sshll.u32 %s729_s29, 4  ;;  %s33_s4 = sadd.s32 1, %s723_s18  ;;  %s138_s30 = int_to_ptr.vmem [resolvable:$true] %s137_s30 }
  0x11   : > { %p516_p10 = pneg %p810_p8  ;;  %p35_p12 = scmp.ge.s32.totalorder %s33_s4, 2 }
  0x12   : > { %s42_s5 = sadd.s32 1, %s715_s16  ;;  %p49_p13 = scmp.ne.s32.totalorder %s715_s16, %s711_s15 }
  0x13   : > { %p517_p11 = pnand %p516_p10, %p787_p1  ;;  %p50_p0 = scmp.eq.s32.totalorder %s727_s19, 0 }
  0x14   : > { %s947_s4 = smov (%p35_p12, %s33_s4), 0  ;;  %p832_p5 = por %p791_p2, %p49_p13 }
  0x15   : > { %519 = dma.hbm_to_vmem [thread:$0]  (!%p517_p11), %s136_s27, 512, %s138_s30, [#allocation8]  }
  0x16   : > { %p826_p3 = por %p50_p0, %p49_p13  ;;  %s37_s8 = ssub.s32 %s723_s18, %s947_s4 }
  0x17   : > { %p529_p7 = scmp.lt.s32.totalorder %s727_s19, 2  ;;  %p40_p10 = scmp.eq.s32.totalorder %s37_s8, 0 }
  0x18   : > { %s148_s9 = sand.u32 1, %s715_s16   ;;  %s506_s12 = sshll.u32 %s723_s18, 5 }
  0x19   : > { %s490_s10 = sshll.u32 %s148_s9, 5  ;;  %s159_s20 = scalar_lea.hbm %s931_s1, %s506_s12 }
  0x1a   : > { %s841_s11 = scalar_select %p40_p10, %s715_s16, %s42_s5  }
  0x1b   : > { %s152_s25 = scalar_lea.vmem [#allocation4], %s490_s10  ;;  %s161_s22 = sshll.u32 %s159_s20, 4  ;;  %s162_s22 = int_to_ptr.hbm [resolvable:$true] %s161_s22 }
  0x1c   : > { %s163_s26 = sshll.u32 %s152_s25, 4  ;;  %p521_p2 = pnand %p529_p7, %p826_p3  ;;  %s164_s26 = int_to_ptr.vmem [resolvable:$true] %s163_s26 }
  0x1d   : > { %s149_s27 = scalar_lea.sflag [#allocation5], %s148_s9  ;;  %172 = sbr.rel (%p810_p8) target bundleno = 201 (0xc9), region = 28 }
  0x1e   : > { %523 = dma.hbm_to_vmem [thread:$0]  (!%p521_p2), %s162_s22, 512, %s164_s26, %s149_s27  }
  0x1f   : > { %s852_s29 = sand.u32 (!%p810_p8), 1, %s711_s15  }
  0x20   : > { %s494_s30 = sshll.u32 (!%p810_p8), %s852_s29, 5  ;;  %s175_s5 = scalar_lea.sflag (!%p810_p8), [#allocation5], %s852_s29 }
  0x21   : > { %s858_s8 = scalar_lea.vmem (!%p810_p8), [#allocation4], %s494_s30 }
  0x22   : > { %694 = dma.done.wait (%p797_p4), %s175_s5, 512  }
  0x23   : > { %696 = vsyncadd (%p797_p4), %s175_s5, 4294966784 }
  0x24   : > { %698 = dma.done.wait (%p787_p1), [#allocation8], 512  }
  0x25   : > { %700 = vsyncadd (%p787_p1), [#allocation8], 4294966784  ;;  %s206_s28 = sld [smem:[#allocation3]]  ;;  %v208_v0 = vlaneseq  ;;  %s507_s21 = sshll.u32 %s719_s17, 5 }
  0x26   : > { %s384_s10 = scalar_lea.hbm %s933_s3, %s507_s21  ;;  %s204_s12 = scalar_lea.vmem [#allocation9], %s494_s30 }
  0x27   : > { %s386_s13 = sshll.u32 %s204_s12, 4  ;;  %s371_s0 = scalar_lea.sflag [#allocation6], %s852_s29  ;;  %s387_s13 = int_to_ptr.vmem [resolvable:$true] %s386_s13 }
  0x28   : > { %s661_s27 = scalar_lea.hbm %s933_s3, 64 }
  0x2b   : > { %s207_s6 = sadd.s32 %s719_s17, %s206_s28  ;;  %s388_s17 = sshll.u32 %s384_s10, 4  ;;  %s389_s17 = int_to_ptr.hbm [resolvable:$true] %s388_s17 }
  0x2c   : > { %v869_v1 = vstv %s207_s6  ;;  %s655_s20 = sshra.s32 %s389_s17, 4  ;;  %s656_s20 = int_to_ptr.hbm [resolvable:$true] %s655_s20 }
  0x2d   : > { %v212_v2 = vadd.s32 %v869_v1, %v208_v0  ;;  %v210_v17 = vxor.u32 %v869_v1, %v869_v1  ;;  %s657_s25 = scalar_lea.hbm %s656_s20, 32  ;;  %p662_p11 = scmp.lt.s32.totalorder %s656_s20, %s933_s3 }
  0x2e   : > { %p658_p1 = scmp.ne.s32.totalorder %s656_s20, %s657_s25  ;;  %p663_p12 = scmp.lt.s32.totalorder %s661_s27, %s657_s25 }
  0x2f   : > { %v213_v3 = vadd.s32 %v212_v2, %v212_v2  ;;  %v214_v4 = vshll.u32 %v212_v2, 13  ;;  %v215_v5 = vshrl.u32 %v212_v2, 19  ;;  %v874_v22 = vxor.u32 466688986, %v210_v17 }
  0x30   : > { %p659_p4 = pnand %p658_p1, %p832_p5  ;;  %p664_p13 = por %p663_p12, %p662_p11 }
  0x31   : > { %v216_v6 = vor.u32 %v215_v5, %v214_v4 }
  0x32   : > { %p660_p8 = pneg %p659_p4 }
  0x33   : > { %v217_v7 = vxor.u32 %v216_v6, %v213_v3 }
  0x34   : > { %p665_p0 = pnand %p664_p13, %p660_p8 }
  0x35   : > { %v218_v8 = vadd.s32 %v217_v7, %v213_v3  ;;  %v219_v9 = vshll.u32 %v217_v7, 15  ;;  %v220_v10 = vshrl.u32 %v217_v7, 17 }
  0x37   : > { %v221_v11 = vor.u32 %v220_v10, %v219_v9 }
  0x39   : > { %v222_v12 = vxor.u32 %v221_v11, %v218_v8 }
  0x3b   : > { %v223_v13 = vadd.s32 %v222_v12, %v218_v8  ;;  %v224_v14 = vshll.u32 %v222_v12, 26  ;;  %v225_v15 = vshrl.u32 %v222_v12, 6 }
  0x3d   : > { %v226_v16 = vor.u32 %v225_v15, %v224_v14 }
  0x3f   : > { %v227_v18 = vxor.u32 %v226_v16, %v223_v13 }
  0x41   : > { %v228_v19 = vadd.s32 %v227_v18, %v223_v13  ;;  %v229_v20 = vshll.u32 %v227_v18, 6  ;;  %v230_v21 = vshrl.u32 %v227_v18, 26 }
  0x43   : > { %v231_v23 = vor.u32 %v230_v21, %v229_v20  ;;  %v233_v25 = vadd.s32 %v228_v19, %v869_v1 }
  0x45   : > { %v232_v24 = vxor.u32 %v231_v23, %v228_v19 }
  0x47   : > { %v234_v26 = vadd.s32 %v232_v24, %v874_v22 }
  0x49   : > { %v235_v27 = vadd.s32 1, %v234_v26 }
  0x4b   : > { %v236_v28 = vadd.s32 %v235_v27, %v233_v25  ;;  %v237_v29 = vshll.u32 %v235_v27, 17  ;;  %v238_v30 = vshrl.u32 %v235_v27, 15 }
  0x4d   : > { %v239_v31 = vor.u32 %v238_v30, %v237_v29 }
  0x4f   : > { %v240_v32 = vxor.u32 %v239_v31, %v236_v28 }
  0x51   : > { %v241_v33 = vadd.s32 %v240_v32, %v236_v28  ;;  %v242_v34 = vshll.u32 %v240_v32, 29  ;;  %v243_v35 = vshrl.u32 %v240_v32, 3 }
  0x53   : > { %v244_v36 = vor.u32 %v243_v35, %v242_v34 }
  0x55   : > { %v245_v37 = vxor.u32 %v244_v36, %v241_v33 }
  0x57   : > { %v246_v38 = vadd.s32 %v245_v37, %v241_v33  ;;  %v247_v39 = vshll.u32 %v245_v37, 16  ;;  %v248_v40 = vshrl.u32 %v245_v37, 16 }
  0x59   : > { %v249_v41 = vor.u32 %v248_v40, %v247_v39 }
  0x5b   : > { %v250_v42 = vxor.u32 %v249_v41, %v246_v38 }
  0x5d   : > { %v251_v43 = vadd.s32 %v250_v42, %v246_v38  ;;  %v252_v44 = vshll.u32 %v250_v42, 24  ;;  %v253_v45 = vshrl.u32 %v250_v42, 8 }
  0x5f   : > { %v254_v46 = vor.u32 %v253_v45, %v252_v44  ;;  %v256_v48 = vadd.s32 %v251_v43, %v874_v22 }
  0x61   : > { %v255_v47 = vxor.u32 %v254_v46, %v251_v43 }
  0x63   : > { %v257_v49 = vadd.s32 %v255_v47, %v869_v1 }
  0x65   : > { %v258_v50 = vadd.s32 2, %v257_v49 }
  0x67   : > { %v259_v51 = vadd.s32 %v258_v50, %v256_v48  ;;  %v260_v52 = vshll.u32 %v258_v50, 13  ;;  %v261_v53 = vshrl.u32 %v258_v50, 19 }
  0x69   : > { %v262_v54 = vor.u32 %v261_v53, %v260_v52 }
  0x6b   : > { %v263_v55 = vxor.u32 %v262_v54, %v259_v51 }
  0x6d   : > { %v264_v56 = vadd.s32 %v263_v55, %v259_v51  ;;  %v265_v57 = vshll.u32 %v263_v55, 15  ;;  %v266_v58 = vshrl.u32 %v263_v55, 17 }
  0x6f   : > { %v267_v59 = vor.u32 %v266_v58, %v265_v57  ;;  %v334_v57 = vld [vmem:[%s858_s8] sm:$0xff] }
  0x70   : > { %v338_v58 = vld [vmem:[#allocation7] sm:$0xff] }
  0x71   : > { %v268_v60 = vxor.u32 %v267_v59, %v264_v56  ;;  %v335_v59 = vld [vmem:[%s858_s8 + $0x8] sm:$0xff] }
  0x73   : > { %v269_v61 = vadd.s32 %v268_v60, %v264_v56  ;;  %v270_v62 = vshll.u32 %v268_v60, 26  ;;  %v271_v63 = vshrl.u32 %v268_v60, 6  ;;  %v339_v60 = vld [vmem:[#allocation7 + $0x8] sm:$0xff] }
  0x75   : > { %v272_v0 = vor.u32 %v271_v63, %v270_v62  ;;  %v336_v62 = vld [vmem:[%s858_s8 + $0x10] sm:$0xff] }
  0x76   : > { %v340_v63 = vld [vmem:[#allocation7 + $0x10] sm:$0xff] }
  0x77   : > { %v273_v2 = vxor.u32 %v272_v0, %v269_v61  ;;  %v342_v0 = vadd.f32 %v338_v58, %v334_v57 }
  0x79   : > { %v274_v3 = vadd.s32 %v273_v2, %v269_v61  ;;  %v275_v4 = vshll.u32 %v273_v2, 6  ;;  %v276_v5 = vshrl.u32 %v273_v2, 26  ;;  %v337_v2 = vld [vmem:[%s858_s8 + $0x18] sm:$0xff] }
  0x7b   : > { %v277_v6 = vor.u32 %v276_v5, %v275_v4  ;;  %v279_v8 = vadd.s32 %v274_v3, %v869_v1  ;;  %v343_v5 = vadd.f32 %v339_v60, %v335_v59 }
  0x7d   : > { %v278_v7 = vxor.u32 %v277_v6, %v274_v3  ;;  %v341_v3 = vld [vmem:[#allocation7 + $0x18] sm:$0xff]  ;;  %v344_v6 = vadd.f32 %v340_v63, %v336_v62 }
  0x7f   : > { %v280_v9 = vadd.s32 %v278_v7, %v869_v1  ;;  %v345_v7 = vadd.f32 %v341_v3, %v337_v2 }
  0x81   : > { %v281_v10 = vadd.s32 3, %v280_v9 }
  0x83   : > { %v282_v11 = vadd.s32 %v281_v10, %v279_v8  ;;  %v283_v12 = vshll.u32 %v281_v10, 17  ;;  %v284_v13 = vshrl.u32 %v281_v10, 15  ;;  %v346_v8 = vmul.f32 1.1111112, %v342_v0 }
  0x84   : > { %v347_v10 = vmul.f32 1.1111112, %v343_v5 }
  0x85   : > { %v285_v14 = vor.u32 %v284_v13, %v283_v12  ;;  %v348_v13 = vmul.f32 1.1111112, %v344_v6 }
  0x87   : > { %v286_v15 = vxor.u32 %v285_v14, %v282_v11 }
  0x89   : > { %v287_v16 = vadd.s32 %v286_v15, %v282_v11  ;;  %v288_v17 = vshll.u32 %v286_v15, 29  ;;  %v289_v18 = vshrl.u32 %v286_v15, 3 }
  0x8b   : > { %v290_v19 = vor.u32 %v289_v18, %v288_v17 }
  0x8d   : > { %v291_v20 = vxor.u32 %v290_v19, %v287_v16 }
  0x8f   : > { %v292_v21 = vadd.s32 %v291_v20, %v287_v16  ;;  %v293_v23 = vshll.u32 %v291_v20, 16  ;;  %v294_v24 = vshrl.u32 %v291_v20, 16  ;;  %v349_v16 = vmul.f32 1.1111112, %v345_v7 }
  0x91   : > { %v295_v25 = vor.u32 %v294_v24, %v293_v23 }
  0x93   : > { %v296_v26 = vxor.u32 %v295_v25, %v292_v21 }
  0x95   : > { %v297_v27 = vadd.s32 %v296_v26, %v292_v21  ;;  %v298_v28 = vshll.u32 %v296_v26, 24  ;;  %v299_v29 = vshrl.u32 %v296_v26, 8 }
  0x97   : > { %v300_v30 = vor.u32 %v299_v29, %v298_v28  ;;  %v302_v32 = vadd.s32 %v297_v27, %v869_v1 }
  0x99   : > { %v301_v31 = vxor.u32 %v300_v30, %v297_v27 }
  0x9b   : > { %v303_v33 = vadd.s32 %v301_v31, %v874_v22 }
  0x9d   : > { %v304_v34 = vadd.s32 4, %v303_v33 }
  0x9f   : > { %v305_v35 = vadd.s32 %v304_v34, %v302_v32  ;;  %v306_v36 = vshll.u32 %v304_v34, 13  ;;  %v307_v37 = vshrl.u32 %v304_v34, 19 }
  0xa1   : > { %v308_v38 = vor.u32 %v307_v37, %v306_v36 }
  0xa3   : > { %v309_v39 = vxor.u32 %v308_v38, %v305_v35 }
  0xa5   : > { %v310_v40 = vadd.s32 %v309_v39, %v305_v35  ;;  %v311_v41 = vshll.u32 %v309_v39, 15  ;;  %v312_v42 = vshrl.u32 %v309_v39, 17 }
  0xa7   : > { %v313_v43 = vor.u32 %v312_v42, %v311_v41 }
  0xa9   : > { %v314_v44 = vxor.u32 %v313_v43, %v310_v40 }
  0xab   : > { %v315_v45 = vadd.s32 %v314_v44, %v310_v40  ;;  %v316_v46 = vshll.u32 %v314_v44, 26  ;;  %v317_v47 = vshrl.u32 %v314_v44, 6 }
  0xad   : > { %v318_v48 = vor.u32 %v317_v47, %v316_v46 }
  0xaf   : > { %v319_v49 = vxor.u32 %v318_v48, %v315_v45 }
  0xb1   : > { %v320_v50 = vadd.s32 %v319_v49, %v315_v45  ;;  %v321_v51 = vshll.u32 %v319_v49, 6  ;;  %v322_v52 = vshrl.u32 %v319_v49, 26 }
  0xb3   : > { %v323_v53 = vor.u32 %v322_v52, %v321_v51  ;;  %v325_v55 = vadd.s32 %v320_v50, %v874_v22 }
  0xb5   : > { %v324_v54 = vxor.u32 %v323_v53, %v320_v50 }
  0xb7   : > { %v326_v56 = vadd.s32 %v324_v54, %v869_v1 }
  0xb9   : > { %v327_v61 = vadd.s32 5, %v326_v56 }
  0xbb   : > { %v328_v4 = vxor.u32 %v327_v61, %v325_v55 }
  0xbd   : > { %329 = set.rngseed %v328_v4 }
  0xbe   : > { %v330_v22 = vrng }
  0xbf   : > { %v497_v1 = vxor.u32 2147483648, %v330_v22  ;;  %v331_v9 = vrng }
  0xc0   : > { %v498_v11 = vxor.u32 2147483648, %v331_v9  ;;  %v332_v12 = vrng }
  0xc1   : > { %vm352_vm0 = vcmp.ge.s32.totalorder %v497_v1, 2576980378  ;;  %v499_v14 = vxor.u32 2147483648, %v332_v12  ;;  %v333_v15 = vrng }
  0xc2   : > { %v362_v17 = vsel %vm352_vm0, %v346_v8, 0.0  ;;  %vm355_vm1 = vcmp.ge.s32.totalorder %v498_v11, 2576980378  ;;  %v500_v18 = vxor.u32 2147483648, %v333_v15 }
  0xc3   : > { %366 = vst [vmem:[%s204_s12] sm:$0xff] %v362_v17  ;;  %v363_v19 = vsel %vm355_vm1, %v347_v10, 0.0  ;;  %vm358_vm2 = vcmp.ge.s32.totalorder %v499_v14, 2576980378 }
  0xc4   : > { %367 = vst [vmem:[%s204_s12 + $0x8] sm:$0xff] %v363_v19  ;;  %v364_v20 = vsel %vm358_vm2, %v348_v13, 0.0  ;;  %vm361_vm3 = vcmp.ge.s32.totalorder %v500_v18, 2576980378 }
  0xc5   : > { %368 = vst [vmem:[%s204_s12 + $0x10] sm:$0xff] %v364_v20  ;;  %v365_v21 = vsel %vm361_vm3, %v349_v16, 0.0 }
  0xc6   : > { %369 = vst [vmem:[%s204_s12 + $0x18] sm:$0xff] %v365_v21 }
  0xc7   : > { %668 = shalt.err (!%p665_p0)
}
  0xc8   : > { %514 = dma.vmem_to_hbm [thread:$0]  (%p832_p5), %s387_s13, 512, %s389_s17, %s371_s0  }
  0xc9 PF: > { %s400_s29 = sand.u32 1, %s707_s14   ;;  %p525_p3 = pnand %p489_p9, %p802_p6 }
  0xca   : > { %s401_s8 = scalar_lea.sflag [#allocation6], %s400_s29 }
  0xcb   : > { %p526_p7 = pneg %p525_p3 }
  0xcd   : > { %702 = dma.done.wait (%p526_p7), %s401_s8, 512  }
  0xce   : > { %704 = vsyncadd (%p526_p7), %s401_s8, 4294966784  ;;  %s21_s19 = sadd.s32 1, %s727_s19   ;;  %s941_s14 = smov %s711_s15 }
  0xcf   : > { %p18_p10 = scmp.ge.s32.totalorder %s21_s19, 4   ;;  %s942_s15 = smov %s715_s16 }
  0xd0   : > { %s943_s16 = smov %s841_s11  ;;  %s944_s17 = smov %s723_s18 }
  0xd1   : > { %s945_s18 = smov %s947_s4  ;;  %20 = sbr.rel (!%p18_p10) target bundleno = 9 (0x9), region = 78 }
  0xd6   :  { %407 = vsyncpa [#allocation5], 1 }
  0xd7   :  { %409 = vsyncpa [#allocation5 + $0x1], 1 }
  0xd8   :  { %410 = vsyncpa [#allocation8], 1 }
  0xd9   :  { %411 = vsyncpa [#allocation6], 1 }
  0xda   :  { %413 = vsyncpa [#allocation6 + $0x1], 1 }

// kernel: tpu_custom_call.1
= control target key start
LH: loop header
LB: loop body
LE: loop exit
PB: predicated region body
PF: predicated region fallthrough
CT: control target
= control target key end

     0   :  { %8 = vsyncpa [#allocation3], 0  ;;  %s936_s0 = inlined_call_operand.hbm [shape: f32[2,8,512], index: 0, kind: input, shape index: {}]   ;;  %s937_s1 = inlined_call_operand.hbm [shape: f32[8,512], index: 1, kind: input, shape index: {}]   ;;  %s938_s2 = inlined_call_operand.hbm [shape: u32[2,8,512], index: 2, kind: input, shape index: {}]   ;;  %s939_s3 = inlined_call_operand.hbm [shape: f32[2,8,512], index: 3, kind: output, shape index: {}]  }
   0x1   :  { %10 = vsyncpa [#allocation3 + $0x1], 0 }
   0x2   :  { %11 = vsyncpa [#allocation6], 0 }
   0x3   :  { %12 = vsyncpa [#allocation4], 0 }
   0x4   :  { %14 = vsyncpa [#allocation4 + $0x1], 0  ;;  %s758_s12 = smov 0   ;;  %s760_s13 = smov 0  }
   0x5   :  { %s762_s14 = smov 0   ;;  %s764_s15 = smov 0  }
   0x6   :  { %s766_s16 = smov 0   ;;  %s768_s17 = smov 0  }
   0x7 LB: > { %s32_s18 = sadd.s32 1, %s731_s16  ;;  %s41_s19 = sadd.s32 1, %s723_s14  ;;  %s735_s17 = sphi %s768_s17, %s20_s17   ;;  %s731_s16 = sphi %s766_s16, %s950_s16   ;;  %s727_s15 = sphi %s764_s15, %s949_s15   ;;  %s723_s14 = sphi %s762_s14, %s948_s14   ;;  %s719_s13 = sphi %s760_s13, %s947_s13   ;;  %s715_s12 = sphi %s758_s12, %s946_s12  }
   0x8   : > { %p34_p0 = scmp.ge.s32.totalorder %s32_s18, 2  ;;  %p48_p1 = scmp.ne.s32.totalorder %s723_s14, %s719_s13 }
   0x9   : > { %p49_p2 = scmp.eq.s32.totalorder %s735_s17, 0  ;;  %p453_p3 = scmp.ge.s32.totalorder %s735_s17, 2 }
   0xa   : > { %s952_s18 = smov (%p34_p0, %s32_s18), 0  ;;  %p503_p5 = scmp.lt.s32.totalorder %s735_s17, 2 }
   0xb   : > { %p799_p4 = por %p49_p2, %p48_p1  ;;  %s36_s21 = ssub.s32 %s731_s16, %s952_s18 }
   0xc   : > { %s175_s22 = sand.u32 1, %s735_s17   ;;  %p39_p6 = scmp.eq.s32.totalorder %s36_s21, 0 }
   0xd   : > { %s177_s23 = sand.u32 1, %s723_s14   ;;  %s474_s24 = sshll.u32 %s731_s16, 5 }
   0xe   : > { %s810_s25 = scalar_select %p39_p6, %s723_s14, %s41_s19  }
   0xf   : > { %s812_s26 = sshll.u32 %s177_s23, 5  ;;  %s186_s29 = scalar_lea.hbm %s936_s0, %s474_s24 }
  0x10   : > { %s188_s30 = sshll.u32 %s186_s29, 4  ;;  %s179_s4 = scalar_lea.vmem [#allocation2], %s812_s26  ;;  %s189_s30 = int_to_ptr.hbm [resolvable:$true] %s188_s30 }
  0x11   : > { %s190_s5 = sshll.u32 %s179_s4, 4  ;;  %p822_p7 = pnand %p503_p5, %p799_p4  ;;  %s191_s5 = int_to_ptr.vmem [resolvable:$true] %s190_s5 }
  0x12   : > { %s208_s9 = scalar_lea.hbm %s938_s2, %s474_s24  ;;  %s176_s10 = scalar_lea.sflag [#allocation3], %s175_s22 }
  0x13   : > { %494 = dma.hbm_to_vmem [thread:$0]  (!%p822_p7), %s189_s30, 512, %s191_s5, %s176_s10  }
  0x14   : > { %s832_s11 = sadd.s32 4294967295, %s735_s17   ;;  %s450_s19 = sadd.s32 4294967294, %s735_s17  }
  0x15   : > { %p54_p8 = scmp.ne.s32.totalorder %s719_s13, %s715_s12  ;;  %p55_p9 = scmp.eq.s32.totalorder %s832_s11, 0 }
  0x16   : > { %p134_p10 = scmp.eq.s32.totalorder %s832_s11, 1  ;;  %p140_p11 = scmp.eq.s32.totalorder %s450_s19, 1 }
  0x17   : > { %p451_p12 = scmp.ge.s32.totalorder %s735_s17, 1  ;;  %p842_p13 = por %p55_p9, %p54_p8 }
  0x18   : > { %p849_p0 = por %p134_p10, %p48_p1  ;;  %p853_p2 = por %p140_p11, %p54_p8 }
  0x19   : > { %p147_p4 = scmp.lt.s32.totalorder %s735_s17, 3  ;;  %s162_s28 = sshll.u32 %s937_s1, 4  ;;  %s163_s28 = int_to_ptr.hbm [resolvable:$true] %s162_s28 }
  0x1a   : > { %s210_s29 = sshll.u32 %s208_s9, 4  ;;  %s737_s30 = smov [#allocation5]   ;;  %s211_s29 = int_to_ptr.hbm [resolvable:$true] %s210_s29 }
  0x1b   : > { %p858_p5 = pnand %p451_p12, %p147_p4  ;;  %s164_s4 = sshll.u32 %s737_s30, 4  ;;  %s165_s4 = int_to_ptr.vmem [resolvable:$true] %s164_s4 }
  0x1c   : > { %s201_s5 = scalar_lea.vmem [#allocation7], %s812_s26  ;;  %s223_s8 = sand.u32 (!%p858_p5), 1, %s832_s11  }
  0x1d   : > { %p487_p1 = pneg %p858_p5  ;;  %s212_s7 = sshll.u32 %s201_s5, 4  ;;  %s213_s7 = int_to_ptr.vmem [resolvable:$true] %s212_s7 }
  0x1e   : > { %497 = dma.hbm_to_vmem [thread:$0]  (!%p822_p7), %s211_s29, 512, %s213_s7, %s176_s10  }
  0x1f   : > { %p488_p6 = pnand %p487_p1, %p55_p9  ;;  %221 = sbr.rel (%p858_p5) target bundleno = 57 (0x39), region = 32 }
  0x20   : > { %s225_s9 = sand.u32 (!%p858_p5), 1, %s719_s13   ;;  %s224_s24 = scalar_lea.sflag (!%p858_p5), [#allocation3], %s223_s8 }
  0x21   : > { %490 = dma.hbm_to_vmem [thread:$0]  (!%p488_p6), %s163_s28, 512, %s165_s4, [#allocation6]  }
  0x22   : > { %s461_s19 = sshll.u32 (!%p858_p5), %s225_s9, 5 }
  0x23   : > { %s227_s27 = scalar_lea.vmem (!%p858_p5), [#allocation2], %s461_s19 }
  0x24   : > { %698 = dma.done.wait (%p842_p13), %s224_s24, 512  }
  0x25   : > { %700 = vsyncadd (%p842_p13), %s224_s24, 4294966784 }
  0x26   : > { %702 = dma.done.wait (%p55_p9), [#allocation6], 512  }
  0x27   : > { %704 = vsyncadd (%p55_p9), [#allocation6], 4294966784  ;;  %s242_s26 = scalar_lea.vmem [#allocation7], %s461_s19 }
  0x28   : > { %706 = dma.done.wait (%p842_p13), %s224_s24, 512  }
  0x29   : > { %708 = vsyncadd (%p842_p13), %s224_s24, 4294966784  ;;  %s476_s6 = sshll.u32 %s727_s15, 5  ;;  %v271_v0 = vld [vmem:[%s227_s27] sm:$0xff]  ;;  %v272_v5 = vld [vmem:[%s227_s27 + $0x8] sm:$0xff]  ;;  %s891_s10 = scalar_lea.vmem [#allocation8], %s461_s19 }
  0x2a   : > { %v275_v1 = vld [vmem:[#allocation5] sm:$0xff]  ;;  %v276_v6 = vld [vmem:[#allocation5 + $0x8] sm:$0xff]  ;;  %s327_s11 = sshll.u32 %s891_s10, 4  ;;  %v273_v10 = vld [vmem:[%s227_s27 + $0x10] sm:$0xff]  ;;  %s325_s15 = scalar_lea.hbm %s939_s3, %s476_s6  ;;  %s328_s11 = int_to_ptr.vmem [resolvable:$true] %s327_s11 }
  0x2b   : > { %v287_v2 = vld [vmem:[%s242_s26] sm:$0xff]  ;;  %v279_v3 = vadd.f32 %v275_v1, %v271_v0  ;;  %v288_v7 = vld [vmem:[%s242_s26 + $0x8] sm:$0xff]  ;;  %v280_v8 = vadd.f32 %v276_v6, %v272_v5  ;;  %v277_v11 = vld [vmem:[#allocation5 + $0x10] sm:$0xff]  ;;  %s329_s28 = sshll.u32 %s325_s15, 4  ;;  %s312_s29 = scalar_lea.sflag [#allocation4], %s225_s9  ;;  %s330_s28 = int_to_ptr.hbm [resolvable:$true] %s329_s28 }
  0x2c   : > { %v465_v4 = vxor.u32 2147483648, %v287_v2  ;;  %v466_v9 = vxor.u32 2147483648, %v288_v7  ;;  %v289_v12 = vld [vmem:[%s242_s26 + $0x10] sm:$0xff]  ;;  %v281_v14 = vadd.f32 %v277_v11, %v273_v10  ;;  %v274_v16 = vld [vmem:[%s227_s27 + $0x18] sm:$0xff]  ;;  %s659_s30 = sshra.s32 %s330_s28, 4  ;;  %s665_s8 = scalar_lea.hbm %s939_s3, 64  ;;  %s660_s30 = int_to_ptr.hbm [resolvable:$true] %s659_s30 }
  0x2d   : > { %v283_v13 = vmul.f32 1.1111112, %v279_v3  ;;  %v467_v15 = vxor.u32 2147483648, %v289_v12  ;;  %v284_v17 = vmul.f32 1.1111112, %v280_v8  ;;  %v278_v18 = vld [vmem:[#allocation5 + $0x18] sm:$0xff]  ;;  %p666_p10 = scmp.lt.s32.totalorder %s660_s30, %s939_s3 }
  0x2e   : > { %vm293_vm0 = vcmp.ge.s32.totalorder %v465_v4, 2576980378  ;;  %vm296_vm1 = vcmp.ge.s32.totalorder %v466_v9, 2576980378  ;;  %v290_v19 = vld [vmem:[%s242_s26 + $0x18] sm:$0xff]  ;;  %v282_v22 = vadd.f32 %v278_v18, %v274_v16  ;;  %s661_s4 = scalar_lea.hbm %s660_s30, 32 }
  0x2f   : > { %v303_v20 = vsel %vm293_vm0, %v283_v13, 0.0  ;;  %v285_v21 = vmul.f32 1.1111112, %v281_v14  ;;  %vm299_vm2 = vcmp.ge.s32.totalorder %v467_v15, 2576980378  ;;  %v304_v23 = vsel %vm296_vm1, %v284_v17, 0.0  ;;  %p662_p7 = scmp.ne.s32.totalorder %s660_s30, %s661_s4  ;;  %p667_p11 = scmp.lt.s32.totalorder %s665_s8, %s661_s4 }
  0x30   : > { %307 = vst [vmem:[%s891_s10] sm:$0xff] %v303_v20  ;;  %v468_v24 = vxor.u32 2147483648, %v290_v19  ;;  %v286_v26 = vmul.f32 1.1111112, %v282_v22 }
  0x31   : > { %308 = vst [vmem:[%s891_s10 + $0x8] sm:$0xff] %v304_v23  ;;  %v305_v25 = vsel %vm299_vm2, %v285_v21, 0.0  ;;  %p663_p8 = pnand %p662_p7, %p849_p0  ;;  %p668_p12 = por %p667_p11, %p666_p10 }
  0x32   : > { %309 = vst [vmem:[%s891_s10 + $0x10] sm:$0xff] %v305_v25  ;;  %vm302_vm3 = vcmp.ge.s32.totalorder %v468_v24, 2576980378 }
  0x33   : > { %v306_v27 = vsel %vm302_vm3, %v286_v26, 0.0  ;;  %p664_p9 = pneg %p663_p8 }
  0x34   : > { %310 = vst [vmem:[%s891_s10 + $0x18] sm:$0xff] %v306_v27 }
  0x35   : > { %p669_p13 = pnand %p668_p12, %p664_p9 }
  0x37   : > { %672 = shalt.err (!%p669_p13)
}
  0x38   : > { %485 = dma.vmem_to_hbm [thread:$0]  (%p849_p0), %s328_s11, 512, %s330_s28, %s312_s29  }
  0x39 PF: > { %s341_s9 = sand.u32 1, %s715_s12   ;;  %p499_p4 = pnand %p453_p3, %p853_p2 }
  0x3a   : > { %s342_s27 = scalar_lea.sflag [#allocation4], %s341_s9 }
  0x3b   : > { %p500_p5 = pneg %p499_p4 }
  0x3d   : > { %710 = dma.done.wait (%p500_p5), %s342_s27, 512  }
  0x3e   : > { %712 = vsyncadd (%p500_p5), %s342_s27, 4294966784  ;;  %s20_s17 = sadd.s32 1, %s735_s17   ;;  %s946_s12 = smov %s719_s13 }
  0x3f   : > { %p17_p1 = scmp.ge.s32.totalorder %s20_s17, 4   ;;  %s947_s13 = smov %s723_s14 }
  0x40   : > { %s948_s14 = smov %s810_s25  ;;  %s949_s15 = smov %s731_s16 }
  0x41   : > { %s950_s16 = smov %s952_s18  ;;  %19 = sbr.rel (!%p17_p1) target bundleno = 7 (0x7), region = 93 }
  0x46   :  { %348 = vsyncpa [#allocation3], 1 }
  0x47   :  { %350 = vsyncpa [#allocation3 + $0x1], 1 }
  0x48   :  { %351 = vsyncpa [#allocation6], 1 }
  0x49   :  { %352 = vsyncpa [#allocation4], 1 }
  0x4a   :  { %354 = vsyncpa [#allocation4 + $0x1], 1 }

</bundles_post_ra>
